<compile_context>
chip_gen: v7x
topology: tpu7x:2x2x1
jax: 0.10.0
libtpu: 0.0.40
codegen_flags: <defaults>
</compile_context>

<pallas_src>
import functools

import jax
import jax.numpy as jnp
import numpy as np
from jax import lax
from jax.experimental import pallas as pl
from jax.experimental.pallas import tpu as pltpu

LANE = 128
_REAL = ("real", "normal", "gauss")
_POS = ("pos", "count", "poisson")
_BIN = ("bin", "bernoulli", "bern")
_CAT = ("cat", "categorical", "ordinal")


# ----------------------------- helpers ---------------------------------------
def get_dim_from_type(feat_dists):
    return sum(d for (_, d) in feat_dists)


def _round_up(v, m):
    return ((v + m - 1) // m) * m


def _softplus(x):
    return jnp.maximum(x, 0.0) + jnp.log1p(jnp.exp(-jnp.abs(x)))


def _sigmoid(x):
    return 1.0 / (1.0 + jnp.exp(-x))


def _choose_batch_tile(batch, dtype, max_tile=512):
    """Largest tile (multiple of the dtype's sublane unit, <= max_tile) that
    still leaves >=2 grid tiles when the batch allows it (v7x dual-TC)."""
    sub = max(8, 32 // np.dtype(dtype).itemsize)     # 8 for f32, 16 for bf16
    b = _round_up(max(batch, sub), sub)
    tb = min(max_tile, b)
    if b // tb < 2 and b >= 2 * sub:                 # keep >=2 tiles if we can
        tb = _round_up(-(-b // 2), sub)
    return tb


# ----------------------------- Pallas kernel ---------------------------------
def _decoder_kernel(x_ref, *refs, L, seg_info, max_k, use_dropout, has_cat):
    """refs = (W0, b0, ..., W_{L-1}, b_{L-1}[, mask_0..mask_{L-2}][, P], out).

    W_ll : [in_pad, out_pad] compute dtype (pre-transposed, zero-padded)
    b_ll : f32 [1, out_pad]
    mask : f32 [TB, hid_pad] with values {0, 1/(1-p)}      (inverted dropout)
    P    : f32 [out_pad, out_pad] block-diagonal same-cat-segment matrix
    x    : [TB, in_pad] compute dtype
    out  : f32 [TB, out_pad]
    """
    out_ref = refs[-1]
    param_refs = refs[:2 * L]
    idx = 2 * L
    mask_refs = ()
    if use_dropout:
        mask_refs = refs[idx:idx + (L - 1)]
        idx += L - 1
    p_ref = refs[idx] if has_cat else None

    h = x_ref[...]
    for ll in range(L):
        w = param_refs[2 * ll][...]          # [in_pad, out_pad]
        b = param_refs[2 * ll + 1][...]      # [1, out_pad] f32
        # Clean MXU contraction h @ W (f32 accumulation).
        h = jnp.dot(h.astype(w.dtype), w,
                    preferred_element_type=jnp.float32) + b
        if ll < L - 1:
            h = jnp.maximum(h, 0.0)          # ReLU (f32)
            if use_dropout:
                h = h * mask_refs[ll][...]   # inverted dropout

    # ---- final layer: per-feature activations, full padded width -----------
    col = lax.broadcasted_iota(jnp.int32, h.shape, 1)
    res = h                                  # identity: 'real' + padding lanes

    def seg_mask(segs):
        m = None
        for o, d in segs:
            mm = (col >= o) & (col < o + d)
            m = mm if m is None else (m | mm)
        return m

    pos_segs = [(o, d) for (t, o, d) in seg_info if t in _POS]
    bin_segs = [(o, d) for (t, o, d) in seg_info if t in _BIN]
    cat_segs = [(o, d) for (t, o, d) in seg_info if t in _CAT]

    if pos_segs:
        res = jnp.where(seg_mask(pos_segs), jnp.minimum(_softplus(h), max_k), res)
    if bin_segs:
        res = jnp.where(seg_mask(bin_segs), _sigmoid(h), res)
    if has_cat and cat_segs:
        # Segmented softmax: one masked row-max (same shift for every segment
        # in a row is mathematically exact) and one matmul against the
        # block-diagonal membership matrix for all denominators at once.
        m = seg_mask(cat_segs)
        gmax = jnp.max(jnp.where(m, h, -jnp.inf), axis=-1, keepdims=True)
        e = jnp.exp(jnp.where(m, h - gmax, -jnp.inf))
        denom = jnp.dot(e, p_ref[...], preferred_element_type=jnp.float32)
        denom = jnp.where(m, denom, 1.0)
        res = jnp.where(m, e / denom, res)   # exact divide (rows sum to 1)

    out_ref[...] = res.astype(out_ref.dtype)  # single lane-dense full-tile store


# ----------------------------- wrappers ---------------------------------------
def prepare_decoder_params(net_params, compute_dtype=jnp.float32):
    """Pad / transpose / cast parameters once (hoist out of the MAML inner loop).

    Input layout is PyTorch linear: W_ll = [out_ll, in_ll], b_ll = [out_ll].
    Returns (param_args, padded_dims, dims):
      W_ll -> compute_dtype [in_pad, out_pad]   (pre-transposed)
      b_ll -> f32           [1, out_pad]
    """
    L = len(net_params) // 2
    dims = [int(net_params[0].shape[1])] + \
           [int(net_params[2 * ll].shape[0]) for ll in range(L)]
    pdims = [_round_up(d, LANE) for d in dims]
    args = []
    for ll in range(L):
        w = jnp.asarray(net_params[2 * ll], jnp.float32)       # [out, in]
        b = jnp.asarray(net_params[2 * ll + 1], jnp.float32)   # [out]
        w_t = w.T                                              # [in, out]
        w_p = jnp.zeros((pdims[ll], pdims[ll + 1]), compute_dtype)
        w_p = w_p.at[:w_t.shape[0], :w_t.shape[1]].set(w_t.astype(compute_dtype))
        b_p = jnp.zeros((1, pdims[ll + 1]), jnp.float32)
        b_p = b_p.at[0, :b.shape[0]].set(b)
        args += [w_p, b_p]
    return args, pdims, dims


def decoder_meta_forward(net_in, net_params=None, *, feat_dists, max_k=10000.0,
                         dropout_p=0.2, training=False, rng_key=None,
                         dropout_masks=None, batch_tile=None,
                         compute_dtype=jnp.float32, prepared=None,
                         single_buffer_params=False):
    """Forward pass of Decoder_Meta.

    net_params: flat list [W0, b0, W1, b1, ...] (PyTorch shapes) — or pass
    `prepared=prepare_decoder_params(net_params, compute_dtype)` to hoist the
    padding/cast out of a MAML inner loop. `dropout_masks` (list of boolean
    keep-masks of shape [B, hidden_ll]) may be supplied for determinism;
    otherwise they are drawn from `rng_key` when training.
    """
    if prepared is None:
        prepared = prepare_decoder_params(net_params, compute_dtype)
    param_args, pdims, dims = prepared
    L = len(param_args) // 2
    out_dim = get_dim_from_type(feat_dists)
    B, D_in = net_in.shape

    TB = batch_tile if batch_tile is not None else _choose_batch_tile(B, compute_dtype)
    B_pad = _round_up(max(B, TB), TB)

    # Padded input streamed in the compute dtype (bf16 halves HBM bytes).
    x_p = jnp.zeros((B_pad, pdims[0]), compute_dtype)
    x_p = x_p.at[:B, :D_in].set(jnp.asarray(net_in).astype(compute_dtype))

    # Static (type, offset, dim) table for the final activations.
    seg_info, off = [], 0
    for typ, dim in feat_dists:
        seg_info.append((typ, off, dim))
        off += dim
    assert off == out_dim <= pdims[-1]

    # Dropout: host-side mask generation (no TPU-only PRNG in the kernel).
    use_dropout = bool(training) and float(dropout_p) > 0.0 and L > 1
    mask_args = []
    if use_dropout:
        inv_keep = 1.0 / (1.0 - float(dropout_p))
        if dropout_masks is None:
            assert rng_key is not None, "training=True needs rng_key or dropout_masks"
            keys = jax.random.split(rng_key, L - 1)
            dropout_masks = [jax.random.bernoulli(keys[ll], 1.0 - float(dropout_p),
                                                  (B, dims[ll + 1]))
                             for ll in range(L - 1)]
        for ll in range(L - 1):
            keep = jnp.asarray(dropout_masks[ll]).astype(jnp.float32) * inv_keep
            m_p = jnp.zeros((B_pad, pdims[ll + 1]), jnp.float32)
            m_p = m_p.at[:B, :dims[ll + 1]].set(keep)
            mask_args.append(m_p)

    # Block-diagonal "same categorical segment" matrix (host constant).
    cat_segs = [(o, d) for (t, o, d) in seg_info if t in _CAT]
    has_cat = len(cat_segs) > 0
    extra_args = []
    if has_cat:
        D = pdims[-1]
        P = np.zeros((D, D), np.float32)
        for o, d in cat_segs:
            P[o:o + d, o:o + d] = 1.0
        extra_args.append(jnp.asarray(P))

    kernel = functools.partial(
        _decoder_kernel, L=L, seg_info=tuple(seg_info), max_k=float(max_k),
        use_dropout=use_dropout, has_cat=has_cat)

    # Optional single-buffering of the never-changing resident params
    # (v7x VMEM budget when hidden dims are large).
    w_mode = dict(pipeline_mode=pl.Buffered(1)) if single_buffer_params else {}

    in_specs = [pl.BlockSpec((TB, pdims[0]), lambda i: (i, 0))]          # x tiles
    for ll in range(L):                                                  # resident params
        in_specs.append(pl.BlockSpec((pdims[ll], pdims[ll + 1]),
                                     lambda i: (0, 0), **w_mode))
        in_specs.append(pl.BlockSpec((1, pdims[ll + 1]),
                                     lambda i: (0, 0), **w_mode))
    if use_dropout:                                                      # mask tiles
        for ll in range(L - 1):
            in_specs.append(pl.BlockSpec((TB, pdims[ll + 1]), lambda i: (i, 0)))
    if has_cat:                                                          # resident P
        in_specs.append(pl.BlockSpec((pdims[-1], pdims[-1]),
                                     lambda i: (0, 0), **w_mode))
    out_specs = pl.BlockSpec((TB, pdims[-1]), lambda i: (i, 0))

    fn = pl.pallas_call(
        kernel,
        out_shape=jax.ShapeDtypeStruct((B_pad, pdims[-1]), jnp.float32),
        grid=(B_pad // TB,),
        in_specs=in_specs,
        out_specs=out_specs,
        compiler_params=pltpu.CompilerParams(
            dimension_semantics=("parallel",),      # batch tiles -> both TCs on v7x
            vmem_limit_bytes=32 * 1024 * 1024),
    )
    out_p = fn(x_p, *param_args, *mask_args, *extra_args)
    return out_p[:B, :out_dim]


# ----------------------------- reference (plain JAX) --------------------------
def _apply_feat_activations_ref(y, feat_dists, max_k):
    segs, off = [], 0
    for typ, dim in feat_dists:
        seg = y[:, off:off + dim]
        if typ in _POS:
            seg = jnp.minimum(_softplus(seg), max_k)
        elif typ in _BIN:
            seg = _sigmoid(seg)
        elif typ in _CAT:
            m = jnp.max(seg, axis=-1, keepdims=True)
            e = jnp.exp(seg - m)
            seg = e / jnp.sum(e, axis=-1, keepdims=True)
        segs.append(seg)
        off += dim
    return jnp.concatenate(segs, axis=-1)


def decoder_meta_reference(net_in, net_params, feat_dists, max_k=10000.0,
                           dropout_p=0.0, dropout_keep_masks=None,
                           bf16_matmul=False):
    L = len(net_params) // 2
    h = jnp.asarray(net_in, jnp.float32)
    for ll in range(L):
        w = jnp.asarray(net_params[2 * ll], jnp.float32)
        b = jnp.asarray(net_params[2 * ll + 1], jnp.float32)
        if bf16_matmul:
            h = jnp.dot(h.astype(jnp.bfloat16), w.astype(jnp.bfloat16).T,
                        preferred_element_type=jnp.float32) + b
        else:
            h = jnp.dot(h, w.T, precision=lax.Precision.HIGHEST) + b
        if ll < L - 1:
            h = jnp.maximum(h, 0.0)
            if dropout_keep_masks is not None:
                h = h * dropout_keep_masks[ll].astype(jnp.float32) / (1.0 - dropout_p)
    return _apply_feat_activations_ref(h, feat_dists, max_k)


# ----------------------------- main -------------------------------------------
if __name__ == "__main__":
    key = jax.random.PRNGKey(0)

    # Small shapes implied by the module: B x latent -> hidden -> out_dim.
    B, D_IN, HIDDEN = 16, 16, 32
    feat_dists = [("real", 3), ("pos", 2), ("bin", 3),
                  ("cat", 4), ("cat", 5), ("count", 2)]
    out_dim = get_dim_from_type(feat_dists)   # 19
    L = 2                                     # hidden_layers

    # Deterministic parameter init (PyTorch-linear-style shapes [out, in]).
    dims = [D_IN, HIDDEN, out_dim]
    net_params = []
    for ll in range(L):
        key, kw, kb = jax.random.split(key, 3)
        scale = 1.0 / np.sqrt(dims[ll])
        net_params.append(jax.random.uniform(
            kw, (dims[ll + 1], dims[ll]), jnp.float32, -scale, scale))
        net_params.append(jax.random.uniform(
            kb, (dims[ll + 1],), jnp.float32, -scale, scale))

    key, kx = jax.random.split(key)
    net_in = jax.random.normal(kx, (B, D_IN), jnp.float32)

    # --- eval mode, f32 compute (matches the PyTorch f32 module) -------------
    prepared_f32 = prepare_decoder_params(net_params, jnp.float32)
    fwd_f32 = jax.jit(functools.partial(
        decoder_meta_forward, feat_dists=tuple(feat_dists), max_k=10000.0,
        dropout_p=0.2, training=False, prepared=prepared_f32,
        compute_dtype=jnp.float32))
    out_f32 = jax.block_until_ready(fwd_f32(net_in))
    ref_f32 = decoder_meta_reference(net_in, net_params, feat_dists)
    np.testing.assert_allclose(np.asarray(out_f32), np.asarray(ref_f32),
                               rtol=1e-3, atol=1e-3)

    # --- eval mode, bf16 streaming / bf16 MXU operands ------------------------
    prepared_bf16 = prepare_decoder_params(net_params, jnp.bfloat16)
    fwd_bf16 = jax.jit(functools.partial(
        decoder_meta_forward, feat_dists=tuple(feat_dists), max_k=10000.0,
        dropout_p=0.2, training=False, prepared=prepared_bf16,
        compute_dtype=jnp.bfloat16))
    out_bf16 = jax.block_until_ready(fwd_bf16(net_in))
    ref_bf16 = decoder_meta_reference(net_in, net_params, feat_dists,
                                      bf16_matmul=True)
    np.testing.assert_allclose(np.asarray(out_bf16), np.asarray(ref_bf16),
                               rtol=5e-3, atol=5e-3)
    np.testing.assert_allclose(np.asarray(out_bf16), np.asarray(ref_f32),
                               rtol=3e-2, atol=3e-2)

    # --- training mode (dropout) with an explicit keep-mask -> exact check ----
    key, km = jax.random.split(key)
    keep0 = jax.random.bernoulli(km, 0.8, (B, HIDDEN))
    out_tr = decoder_meta_forward(net_in, feat_dists=feat_dists, max_k=10000.0,
                                  dropout_p=0.2, training=True,
                                  dropout_masks=[keep0],
                                  prepared=prepared_f32,
                                  compute_dtype=jnp.float32)
    out_tr = jax.block_until_ready(out_tr)
    ref_tr = decoder_meta_reference(net_in, net_params, feat_dists,
                                    dropout_p=0.2, dropout_keep_masks=[keep0])
    np.testing.assert_allclose(np.asarray(out_tr), np.asarray(ref_tr),
                               rtol=1e-3, atol=1e-3)

    # --- training mode with wrapper-drawn masks (sanity only) -----------------
    out_tr2 = decoder_meta_forward(net_in, feat_dists=feat_dists, max_k=10000.0,
                                   dropout_p=0.2, training=True,
                                   rng_key=jax.random.PRNGKey(123),
                                   prepared=prepared_bf16,
                                   compute_dtype=jnp.bfloat16)
    out_tr2 = jax.block_until_ready(out_tr2)
    assert out_tr2.shape == (B, out_dim)
    assert bool(jnp.all(jnp.isfinite(out_tr2)))

    # --- larger batch to exercise the big-tile / multi-tile grid path ---------
    key, kx2 = jax.random.split(key)
    net_in_big = jax.random.normal(kx2, (320, D_IN), jnp.float32)
    out_big = jax.block_until_ready(fwd_f32(net_in_big))
    ref_big = decoder_meta_reference(net_in_big, net_params, feat_dists)
    np.testing.assert_allclose(np.asarray(out_big), np.asarray(ref_big),
                               rtol=1e-3, atol=1e-3)

    print("KERNEL_OK")
</pallas_src>

<mosaic_0001>
module attributes {stable_mosaic.version = 11 : i64} {
  func.func @_decoder_kernel(%arg0: i32, %arg1: memref<8x128xf32, #tpu.memory_space<vmem>>, %arg2: memref<128x128xf32, #tpu.memory_space<vmem>>, %arg3: memref<1x128xf32, #tpu.memory_space<vmem>>, %arg4: memref<128x128xf32, #tpu.memory_space<vmem>>, %arg5: memref<1x128xf32, #tpu.memory_space<vmem>>, %arg6: memref<128x128xf32, #tpu.memory_space<vmem>>, %arg7: memref<8x128xf32, #tpu.memory_space<vmem>>) attributes {dimension_semantics = [#tpu.dimension_semantics<parallel>], iteration_bounds = array<i64: 2>, scalar_prefetch = 0 : i64, scratch_operands = 0 : i64, tpu.core_type = #tpu.core_type<tc>, window_params = [{transform_indices = @transform_0, window_bounds = array<i64: 8, 128>}, {pipeline_mode = #tpu.pipeline_mode<synchronous>, transform_indices = @transform_1, window_bounds = array<i64: 128, 128>}, {pipeline_mode = #tpu.pipeline_mode<synchronous>, transform_indices = @transform_2, window_bounds = array<i64: 1, 128>}, {pipeline_mode = #tpu.pipeline_mode<synchronous>, transform_indices = @transform_3, window_bounds = array<i64: 128, 128>}, {pipeline_mode = #tpu.pipeline_mode<synchronous>, transform_indices = @transform_4, window_bounds = array<i64: 1, 128>}, {pipeline_mode = #tpu.pipeline_mode<synchronous>, transform_indices = @transform_5, window_bounds = array<i64: 128, 128>}, {transform_indices = @transform_6, window_bounds = array<i64: 8, 128>}]} {
    %c0 = arith.constant 0 : index
    %c0_0 = arith.constant 0 : index
    %0 = vector.load %arg1[%c0, %c0_0] : memref<8x128xf32, #tpu.memory_space<vmem>>, vector<8x128xf32>
    %c0_1 = arith.constant 0 : index
    %c0_2 = arith.constant 0 : index
    %1 = vector.load %arg2[%c0_1, %c0_2] : memref<128x128xf32, #tpu.memory_space<vmem>>, vector<128x128xf32>
    %c0_3 = arith.constant 0 : index
    %c0_4 = arith.constant 0 : index
    %2 = vector.load %arg3[%c0_3, %c0_4] : memref<1x128xf32, #tpu.memory_space<vmem>>, vector<1x128xf32>
    %cst = arith.constant dense<0.000000e+00> : vector<8x128xf32>
    %3 = tpu.matmul %0, %1, %cst {dimension_numbers = #tpu.dot_dimension_numbers<[1], [0], [0], [1], [0, 0, 1, 1], [], []>} : vector<8x128xf32>, vector<128x128xf32>, vector<8x128xf32> -> vector<8x128xf32>
    %4 = vector.broadcast %2 : vector<1x128xf32> to vector<8x128xf32>
    %5 = arith.addf %3, %4 : vector<8x128xf32>
    %cst_5 = arith.constant 0.000000e+00 : f32
    %6 = vector.broadcast %cst_5 : f32 to vector<8x128xf32>
    %7 = arith.maximumf %5, %6 : vector<8x128xf32>
    %c0_6 = arith.constant 0 : index
    %c0_7 = arith.constant 0 : index
    %8 = vector.load %arg4[%c0_6, %c0_7] : memref<128x128xf32, #tpu.memory_space<vmem>>, vector<128x128xf32>
    %c0_8 = arith.constant 0 : index
    %c0_9 = arith.constant 0 : index
    %9 = vector.load %arg5[%c0_8, %c0_9] : memref<1x128xf32, #tpu.memory_space<vmem>>, vector<1x128xf32>
    %cst_10 = arith.constant dense<0.000000e+00> : vector<8x128xf32>
    %10 = tpu.matmul %7, %8, %cst_10 {dimension_numbers = #tpu.dot_dimension_numbers<[1], [0], [0], [1], [0, 0, 1, 1], [], []>} : vector<8x128xf32>, vector<128x128xf32>, vector<8x128xf32> -> vector<8x128xf32>
    %11 = vector.broadcast %9 : vector<1x128xf32> to vector<8x128xf32>
    %12 = arith.addf %10, %11 : vector<8x128xf32>
    %13 = tpu.iota {dimensions = array<i32: 1>} : vector<8x128xi32>
    %c3_i32 = arith.constant 3 : i32
    %14 = vector.broadcast %c3_i32 : i32 to vector<8x128xi32>
    %15 = arith.cmpi sge, %13, %14 : vector<8x128xi32>
    %c5_i32 = arith.constant 5 : i32
    %16 = vector.broadcast %c5_i32 : i32 to vector<8x128xi32>
    %17 = arith.cmpi slt, %13, %16 : vector<8x128xi32>
    %18 = arith.andi %15, %17 : vector<8x128xi1>
    %c17_i32 = arith.constant 17 : i32
    %19 = vector.broadcast %c17_i32 : i32 to vector<8x128xi32>
    %20 = arith.cmpi sge, %13, %19 : vector<8x128xi32>
    %c19_i32 = arith.constant 19 : i32
    %21 = vector.broadcast %c19_i32 : i32 to vector<8x128xi32>
    %22 = arith.cmpi slt, %13, %21 : vector<8x128xi32>
    %23 = arith.andi %20, %22 : vector<8x128xi1>
    %24 = arith.ori %18, %23 : vector<8x128xi1>
    %cst_11 = arith.constant 0.000000e+00 : f32
    %25 = vector.broadcast %cst_11 : f32 to vector<8x128xf32>
    %26 = arith.maximumf %12, %25 : vector<8x128xf32>
    %27 = math.absf %12 : vector<8x128xf32>
    %cst_12 = arith.constant 0.000000e+00 : f32
    %28 = vector.broadcast %cst_12 : f32 to vector<8x128xf32>
    %29 = arith.subf %28, %27 : vector<8x128xf32>
    %30 = math.exp %29 : vector<8x128xf32>
    %31 = math.log1p %30 : vector<8x128xf32>
    %32 = arith.addf %26, %31 : vector<8x128xf32>
    %cst_13 = arith.constant 1.000000e+04 : f32
    %33 = vector.broadcast %cst_13 : f32 to vector<8x128xf32>
    %34 = arith.minimumf %32, %33 : vector<8x128xf32>
    %35 = arith.select %24, %34, %12 : vector<8x128xi1>, vector<8x128xf32>
    %c5_i32_14 = arith.constant 5 : i32
    %36 = vector.broadcast %c5_i32_14 : i32 to vector<8x128xi32>
    %37 = arith.cmpi sge, %13, %36 : vector<8x128xi32>
    %c8_i32 = arith.constant 8 : i32
    %38 = vector.broadcast %c8_i32 : i32 to vector<8x128xi32>
    %39 = arith.cmpi slt, %13, %38 : vector<8x128xi32>
    %40 = arith.andi %37, %39 : vector<8x128xi1>
    %cst_15 = arith.constant 0.000000e+00 : f32
    %41 = vector.broadcast %cst_15 : f32 to vector<8x128xf32>
    %42 = arith.subf %41, %12 : vector<8x128xf32>
    %43 = math.exp %42 : vector<8x128xf32>
    %cst_16 = arith.constant 1.000000e+00 : f32
    %44 = vector.broadcast %cst_16 : f32 to vector<8x128xf32>
    %45 = arith.addf %44, %43 : vector<8x128xf32>
    %cst_17 = arith.constant 1.000000e+00 : f32
    %46 = vector.broadcast %cst_17 : f32 to vector<8x128xf32>
    %47 = arith.divf %46, %45 : vector<8x128xf32>
    %48 = arith.select %40, %47, %35 : vector<8x128xi1>, vector<8x128xf32>
    %c8_i32_18 = arith.constant 8 : i32
    %49 = vector.broadcast %c8_i32_18 : i32 to vector<8x128xi32>
    %50 = arith.cmpi sge, %13, %49 : vector<8x128xi32>
    %c12_i32 = arith.constant 12 : i32
    %51 = vector.broadcast %c12_i32 : i32 to vector<8x128xi32>
    %52 = arith.cmpi slt, %13, %51 : vector<8x128xi32>
    %53 = arith.andi %50, %52 : vector<8x128xi1>
    %c12_i32_19 = arith.constant 12 : i32
    %54 = vector.broadcast %c12_i32_19 : i32 to vector<8x128xi32>
    %55 = arith.cmpi sge, %13, %54 : vector<8x128xi32>
    %c17_i32_20 = arith.constant 17 : i32
    %56 = vector.broadcast %c17_i32_20 : i32 to vector<8x128xi32>
    %57 = arith.cmpi slt, %13, %56 : vector<8x128xi32>
    %58 = arith.andi %55, %57 : vector<8x128xi1>
    %59 = arith.ori %53, %58 : vector<8x128xi1>
    %cst_21 = arith.constant 0xFF800000 : f32
    %60 = vector.broadcast %cst_21 : f32 to vector<8x128xf32>
    %61 = arith.select %59, %12, %60 : vector<8x128xi1>, vector<8x128xf32>
    %cst_22 = arith.constant dense<0xFF800000> : vector<8xf32>
    %62 = vector.multi_reduction <maximumf>, %61, %cst_22 [1] : vector<8x128xf32> to vector<8xf32>
    %63 = vector.shape_cast %62 : vector<8xf32> to vector<8x1xf32>
    %64 = vector.broadcast %63 : vector<8x1xf32> to vector<8x128xf32>
    %65 = arith.subf %12, %64 : vector<8x128xf32>
    %cst_23 = arith.constant 0xFF800000 : f32
    %66 = vector.broadcast %cst_23 : f32 to vector<8x128xf32>
    %67 = arith.select %59, %65, %66 : vector<8x128xi1>, vector<8x128xf32>
    %68 = math.exp %67 : vector<8x128xf32>
    %c0_24 = arith.constant 0 : index
    %c0_25 = arith.constant 0 : index
    %69 = vector.load %arg6[%c0_24, %c0_25] : memref<128x128xf32, #tpu.memory_space<vmem>>, vector<128x128xf32>
    %cst_26 = arith.constant dense<0.000000e+00> : vector<8x128xf32>
    %70 = tpu.matmul %68, %69, %cst_26 {dimension_numbers = #tpu.dot_dimension_numbers<[1], [0], [0], [1], [0, 0, 1, 1], [], []>} : vector<8x128xf32>, vector<128x128xf32>, vector<8x128xf32> -> vector<8x128xf32>
    %cst_27 = arith.constant 1.000000e+00 : f32
    %71 = vector.broadcast %cst_27 : f32 to vector<8x128xf32>
    %72 = arith.select %59, %70, %71 : vector<8x128xi1>, vector<8x128xf32>
    %73 = arith.divf %68, %72 : vector<8x128xf32>
    %74 = arith.select %59, %73, %48 : vector<8x128xi1>, vector<8x128xf32>
    %c0_28 = arith.constant 0 : index
    %c0_29 = arith.constant 0 : index
    %75 = vector.load %arg7[%c0_28, %c0_29] : memref<8x128xf32, #tpu.memory_space<vmem>>, vector<8x128xf32>
    tpu.vector_store %arg7[%c0_28, %c0_29], %74 {strides = array<i32>} : memref<8x128xf32, #tpu.memory_space<vmem>>, vector<8x128xf32>,
    return
  }
  func.func @transform_0(%arg0: i32) -> (i32, i32) {
    %c0_i32 = arith.constant 0 : i32
    %c0_i32_0 = arith.constant 0 : i32
    return %arg0, %c0_i32 : i32, i32
  }
  func.func @transform_1(%arg0: i32) -> (i32, i32) {
    %c0_i32 = arith.constant 0 : i32
    %c0_i32_0 = arith.constant 0 : i32
    %c0_i32_1 = arith.constant 0 : i32
    return %c0_i32, %c0_i32_0 : i32, i32
  }
  func.func @transform_2(%arg0: i32) -> (i32, i32) {
    %c0_i32 = arith.constant 0 : i32
    %c0_i32_0 = arith.constant 0 : i32
    %c0_i32_1 = arith.constant 0 : i32
    return %c0_i32, %c0_i32_0 : i32, i32
  }
  func.func @transform_3(%arg0: i32) -> (i32, i32) {
    %c0_i32 = arith.constant 0 : i32
    %c0_i32_0 = arith.constant 0 : i32
    %c0_i32_1 = arith.constant 0 : i32
    return %c0_i32, %c0_i32_0 : i32, i32
  }
  func.func @transform_4(%arg0: i32) -> (i32, i32) {
    %c0_i32 = arith.constant 0 : i32
    %c0_i32_0 = arith.constant 0 : i32
    %c0_i32_1 = arith.constant 0 : i32
    return %c0_i32, %c0_i32_0 : i32, i32
  }
  func.func @transform_5(%arg0: i32) -> (i32, i32) {
    %c0_i32 = arith.constant 0 : i32
    %c0_i32_0 = arith.constant 0 : i32
    %c0_i32_1 = arith.constant 0 : i32
    return %c0_i32, %c0_i32_0 : i32, i32
  }
  func.func @transform_6(%arg0: i32) -> (i32, i32) {
    %c0_i32 = arith.constant 0 : i32
    %c0_i32_0 = arith.constant 0 : i32
    return %arg0, %c0_i32 : i32, i32
  }
}

</mosaic_0001>

<bundles_post_ra>
// kernel: decoder_meta_forward.1
= control target key start
LH: loop header
LB: loop body
LE: loop exit
PB: predicated region body
PF: predicated region fallthrough
CT: control target
= control target key end

     0   :  { %11 = vsyncpa [#allocation3], 0  ;;  %s1534_s0 = inlined_call_operand.vmem [shape: f32[16,128], index: 0, kind: input, shape index: {}]   ;;  %s1535_s1 = inlined_call_operand.hbm [shape: f32[128,128], index: 1, kind: input, shape index: {}]   ;;  %s1536_s2 = inlined_call_operand.vmem [shape: f32[1,128], index: 2, kind: input, shape index: {}]   ;;  %s1537_s3 = inlined_call_operand.hbm [shape: f32[128,128], index: 3, kind: input, shape index: {}]   ;;  %s1538_s4 = inlined_call_operand.vmem [shape: f32[1,128], index: 4, kind: input, shape index: {}]   ;;  %s1539_s5 = inlined_call_operand.hbm [shape: f32[128,128], index: 5, kind: input, shape index: {}]   ;;  %s1540_s6 = inlined_call_operand.hbm [shape: f32[16,128], index: 6, kind: output, shape index: {}]  }
   0x1   :  { %12 = vsyncpa [#allocation6], 0 }
   0x2   :  { %13 = vsyncpa [#allocation4], 0 }
   0x3   :  { %15 = vsyncpa [#allocation4 + $0x1], 0  ;;  %s1257_s21 = smov 0   ;;  %s1259_s22 = smov 0  }
   0x4   :  { %s1261_s23 = smov 0   ;;  %s1263_s24 = smov 0  }
   0x5 LB: > { %1545 = sst [smem:[#allocation12_spill]] %s1207_s23  ;;  %s1278_s25 = sadd.s32 4294967295, %s1211_s24   ;;  %s1211_s24 = sphi %s1263_s24, %s1565_s24   ;;  %s1207_s23 = sphi %s1261_s23, %s1562_s23   ;;  %s1203_s22 = sphi %s1259_s22, %s1564_s22   ;;  %s1199_s21 = sphi %s1257_s21, %s1563_s21  }
   0x6   : > { %s724_s26 = sadd.s32 4294967294, %s1211_s24   ;;  %s1282_s27 = sadd.s32 1, %s1211_s24  }
   0x7   : > { %s159_s28 = sadd.s32 1, %s1207_s23  ;;  %s156_s29 = ssub.s32 %s1211_s24, %s1282_s27 }
   0x8   : > { %p169_p0 = scmp.ne.s32.totalorder %s1207_s23, %s1203_s22  ;;  %p157_p1 = scmp.eq.s32.totalorder %s156_s29, 0 }
   0x9   : > { %p170_p2 = scmp.eq.s32.totalorder %s1278_s25, 1  ;;  %p175_p3 = scmp.ne.s32.totalorder %s1203_s22, %s1199_s21 }
   0xa   : > { %p176_p4 = scmp.eq.s32.totalorder %s724_s26, 1  ;;  %p725_p7 = scmp.ge.s32.totalorder %s1211_s24, 1 }
   0xb   : > { %s1293_s30 = scalar_select %p157_p1, %s1207_s23, %s159_s28  }
   0xc   : > { %p1295_p5 = por %p170_p2, %p169_p0  ;;  %p1299_p6 = por %p176_p4, %p175_p3 }
   0xd   : > { %1546 = sst [smem:[#allocation13_spill]] %s1293_s30  ;;  %p183_p8 = scmp.lt.s32.totalorder %s1211_s24, 3 }
   0xe   : > { %s1547_s7 = scalar_select %p1295_p5, 1, 0 }
   0xf   : > { %s1548_s8 = scalar_select %p1299_p6, 1, 0 }
  0x10   : > { %p1541_p9 = scmp.eq.s32.totalorder %s1278_s25, 0  ;;  %p1306_p10 = pnand %p725_p7, %p183_p8 }
  0x11   : > { %s1213_s10 = smov [#allocation5]   ;;  %s1214_s13 = smov [#allocation2]  }
  0x12   : > { %s1549_s9 = scalar_select %p1306_p10, 1, 0 }
  0x13   : > { %p984_p11 = pneg %p1306_p10  ;;  %s211_s11 = sshll.u32 %s1213_s10, 4  ;;  %s1312_s11 = int_to_ptr.vmem [resolvable:$true] %s211_s11 }
  0x14   : > { %s195_s14 = sshll.u32 %s1214_s13, 4  ;;  %s1215_s15 = smov [#allocation7]   ;;  %s1320_s14 = int_to_ptr.vmem [resolvable:$true] %s195_s14 }
  0x15   : > { %p1316_p12 = pnand %p1541_p9, %p984_p11  ;;  %s1322_s16 = sshll.u32 %s1215_s15, 4  ;;  %s228_s16 = int_to_ptr.vmem [resolvable:$true] %s1322_s16 }
  0x16   : > { %s1057_s19 = scalar_lea.hbm %s1537_s3, 2048 }
  0x17   : > { %p1058_p13 = scmp.ne.s32.totalorder %s1537_s3, %s1057_s19  ;;  %p1332_p0 = pneg %p1316_p12 }
  0x18   : > { %p1064_p3 = scmp.lt.u32.totalorder %s1057_s19, %s1537_s3 }
  0x19   : > { %p1060_p1 = pnand %p1332_p0, %p1058_p13 }
  0x1b   : > { %p1061_p2 = pneg %p1060_p1 }
  0x1d   : > { %p1066_p4 = pnand %p1064_p3, %p1061_p2 }
  0x1f   : > { %1069 = shalt.err (!%p1066_p4)
}
  0x20   : > { %s1070_s13 = scalar_lea.vmem %s1312_s11, 2048  ;;  %p1078_p9 = scmp.lt.s32.totalorder %s1312_s11, %s1312_s11 }
  0x21   : > { %p1071_p7 = scmp.ne.s32.totalorder %s1312_s11, %s1070_s13  ;;  %p1079_p6 = scmp.lt.s32.totalorder %s1070_s13, %s1070_s13 }
  0x23   : > { %p1073_p8 = pnand %p1071_p7, %p1332_p0  ;;  %p1080_p13 = por %p1079_p6, %p1078_p9 }
  0x25   : > { %p1074_p11 = pneg %p1073_p8 }
  0x27   : > { %p1081_p1 = pnand %p1080_p13, %p1074_p11 }
  0x29   : > { %1084 = shalt.err (!%p1081_p1)
}
  0x2a   : > { %s1216_s15 = smov 128   ;;  %s1217_s17 = smov 8  }
  0x2b   : > { %990 = dma.hbm_to_vmem [thread:$0]  (!%p1316_p12), %s1537_s3, 2048, %s1312_s11, [#allocation6], %s1216_s15, %s1216_s15, %s1217_s17  }
  0x2c   : > { %s1085_s29 = scalar_lea.hbm %s1535_s1, 2048 }
  0x2d   : > { %p1086_p6 = scmp.ne.s32.totalorder %s1535_s1, %s1085_s29  ;;  %p1092_p3 = scmp.lt.u32.totalorder %s1085_s29, %s1535_s1 }
  0x2f   : > { %p1088_p9 = pnand %p1086_p6, %p1332_p0 }
  0x31   : > { %p1089_p2 = pneg %p1088_p9 }
  0x33   : > { %p1094_p4 = pnand %p1092_p3, %p1089_p2 }
  0x35   : > { %1097 = shalt.err (!%p1094_p4)
}
  0x36   : > { %s1098_s11 = scalar_lea.vmem %s1320_s14, 2048  ;;  %p1106_p13 = scmp.lt.s32.totalorder %s1320_s14, %s1320_s14 }
  0x37   : > { %p1099_p7 = scmp.ne.s32.totalorder %s1320_s14, %s1098_s11  ;;  %p1107_p1 = scmp.lt.s32.totalorder %s1098_s11, %s1098_s11 }
  0x39   : > { %p1101_p8 = pnand %p1099_p7, %p1332_p0  ;;  %p1108_p6 = por %p1107_p1, %p1106_p13 }
  0x3b   : > { %p1102_p11 = pneg %p1101_p8 }
  0x3d   : > { %p1109_p9 = pnand %p1108_p6, %p1102_p11 }
  0x3f   : > { %1112 = shalt.err (!%p1109_p9)
}
  0x40   : > { %987 = dma.hbm_to_vmem [thread:$0]  (!%p1316_p12), %s1535_s1, 2048, %s1320_s14, [#allocation3], %s1216_s15, %s1216_s15, %s1217_s17  }
  0x41   : > { %s1113_s20 = scalar_lea.hbm %s1539_s5, 2048 }
  0x42   : > { %p1114_p2 = scmp.ne.s32.totalorder %s1539_s5, %s1113_s20  ;;  %p1120_p7 = scmp.lt.u32.totalorder %s1113_s20, %s1539_s5 }
  0x44   : > { %p1116_p3 = pnand %p1114_p2, %p1332_p0 }
  0x46   : > { %p1117_p4 = pneg %p1116_p3 }
  0x48   : > { %p1122_p8 = pnand %p1120_p7, %p1117_p4 }
  0x4a   : > { %1125 = shalt.err (!%p1122_p8)
}
  0x4b   : > { %s1126_s11 = scalar_lea.vmem %s228_s16, 2048  ;;  %p1134_p6 = scmp.lt.s32.totalorder %s228_s16, %s228_s16 }
  0x4c   : > { %p1127_p11 = scmp.ne.s32.totalorder %s228_s16, %s1126_s11  ;;  %p1135_p9 = scmp.lt.s32.totalorder %s1126_s11, %s1126_s11 }
  0x4e   : > { %p1129_p13 = pnand %p1127_p11, %p1332_p0  ;;  %p1136_p5 = por %p1135_p9, %p1134_p6 }
  0x50   : > { %p1130_p1 = pneg %p1129_p13 }
  0x52   : > { %p1137_p10 = pnand %p1136_p5, %p1130_p1 }
  0x54   : > { %1140 = shalt.err (!%p1137_p10)
}
  0x55   : > { %993 = dma.hbm_to_vmem [thread:$0]  (!%p1316_p12), %s1539_s5, 2048, %s228_s16, [#allocation6], %s1216_s15, %s1216_s15, %s1217_s17  }
  0x56   : > { %p1552_p2 = scmp.ne.s32.totalorder %s1549_s9, 0 }
  0x57   : > { %p1553_p0 = scmp.eq.s32.totalorder (!%p1552_p2), %s1278_s25, 0 }
  0x58   : > { %250 = sbr.rel (%p1552_p2) target bundleno = 963 (0x3c3), region = 44 }
  0x5f   : > { %1186 = dma.done.wait (%p1553_p0), [#allocation3], 2048   ;;  %p1554_p3 = pmov %p1553_p0 }
  0x60   : > { %p1555_p5 = pmov %p1553_p0 }
  0x61   : > { %1188 = vsyncadd (%p1554_p3), [#allocation3], 4294965248 }
  0x62   : > { %1190 = dma.done.wait (%p1555_p5), [#allocation6], 4096   ;;  %p1556_p10 = pmov %p1553_p0 }
  0x63   : > { %v1218_v0 = vmov 0.0|0.0   ;;  %vm1219_vm0 = vmmov 0   ;;  %v1220_v1 = vmov 0.0   ;;  %v292_v2 = vld [vmem:[#allocation2] sm:$0xff]  ;;  %v293_v3 = vld [vmem:[#allocation2 + $0x8] sm:$0xff]  ;;  %v294_v4 = vld [vmem:[#allocation2 + $0x10] sm:$0xff] }
  0x64   : > { %1192 = vsyncadd (%p1556_p10), [#allocation6], 4294963200  ;;  %898 = vmatprep.subr.bf16.mxu0 %v1218_v0  ;;  %825 = vmatprep.mubr.msk.f32.mxu0 %vm1219_vm0, %v1220_v1  ;;  %v899_v5 = vpack.c.bf16 %v293_v3, %v292_v2  ;;  %v295_v6 = vld [vmem:[#allocation2 + $0x18] sm:$0xff]  ;;  %v296_v8 = vld [vmem:[#allocation2 + $0x20] sm:$0xff]  ;;  %p287_p12 = scmp.lt.s32.totalorder %s1278_s25, 1  ;;  %s284_s20 = sand.u32 1, %s1203_s22  }
  0x65   : > { %922 = vmatprep.subr.bf16.mxu1 %v1218_v0  ;;  %860 = vmatprep.mubr.msk.f32.mxu1 %vm1219_vm0, %v1220_v1  ;;  %v902_v7 = vpack.c.bf16 %v295_v6, %v294_v4  ;;  %v297_v9 = vld [vmem:[#allocation2 + $0x28] sm:$0xff]  ;;  %v386_v10 = vld [vmem:[#allocation5] sm:$0xff]  ;;  %v388_v12 = vld [vmem:[#allocation5 + $0x10] sm:$0xff]  ;;  %s734_s26 = sshll.u32 %s284_s20, 3  ;;  %s739_s29 = sshll.u32 %s1278_s25, 7 }
  0x66   : > { %900 = vmatpush3.bf16.msra.mxu0 %v899_v5  ;;  %v387_v11 = vld [vmem:[#allocation5 + $0x8] sm:$0xff]  ;;  %v389_v13 = vld [vmem:[#allocation5 + $0x18] sm:$0xff]  ;;  %v905_v14 = vpack.c.bf16 %v297_v9, %v296_v8  ;;  %v298_v16 = vld [vmem:[#allocation2 + $0x30] sm:$0xff]  ;;  %s288_s9 = scalar_select %p287_p12, %s1278_s25, 1  ;;  %v479_v5 = vlaneseq }
  0x67   : > { %901 = vmatprep.subr.bf16.mxu0 %v1218_v0  ;;  %v923_v15 = vpack.c.bf16 %v387_v11, %v386_v10  ;;  %v299_v17 = vld [vmem:[#allocation2 + $0x38] sm:$0xff]  ;;  %v926_v18 = vpack.c.bf16 %v389_v13, %v388_v12  ;;  %v390_v19 = vld [vmem:[#allocation5 + $0x20] sm:$0xff]  ;;  %v391_v20 = vld [vmem:[#allocation5 + $0x28] sm:$0xff]  ;;  %s286_s10 = scalar_lea.vmem [#allocation8], %s734_s26  ;;  %s1490_s23 = scalar_lea.hbm %s1540_s6, %s739_s29 }
  0x68   : > { %v908_v21 = vpack.c.bf16 %v299_v17, %v298_v16  ;;  %v300_v22 = vld [vmem:[#allocation2 + $0x40] sm:$0xff]  ;;  %v301_v23 = vld [vmem:[#allocation2 + $0x48] sm:$0xff]  ;;  %v929_v24 = vpack.c.bf16 %v391_v20, %v390_v19  ;;  %v392_v25 = vld [vmem:[#allocation5 + $0x30] sm:$0xff]  ;;  %s735_s12 = sshll.u32 %s288_s9, 3  ;;  %v1449_v6 = vand.u32 127, %v479_v5  ;;  %s634_s13 = sshll.u32 %s286_s10, 4  ;;  %s1492_s13 = int_to_ptr.vmem [resolvable:$true] %s634_s13 }
  0x69   : > { %924 = vmatpush3.bf16.msra.mxu1 %v923_v15  ;;  %v393_v26 = vld [vmem:[#allocation5 + $0x38] sm:$0xff]  ;;  %v911_v27 = vpack.c.bf16 %v301_v23, %v300_v22  ;;  %v302_v28 = vld [vmem:[#allocation2 + $0x50] sm:$0xff]  ;;  %v394_v31 = vld [vmem:[#allocation5 + $0x40] sm:$0xff]  ;;  %s290_s15 = scalar_lea.vmem %s1534_s0, %s735_s12  ;;  %s621_s25 = scalar_lea.sflag [#allocation4], %s284_s20 }
  0x6a   : > { %903 = vmatpush3.bf16.msra.mxu0 %v902_v7  ;;  %925 = vmatprep.subr.bf16.mxu1 %v1218_v0  ;;  %v303_v29 = vld [vmem:[#allocation2 + $0x58] sm:$0xff]  ;;  %v932_v30 = vpack.c.bf16 %v393_v26, %v392_v25  ;;  %v395_v32 = vld [vmem:[#allocation5 + $0x48] sm:$0xff]  ;;  %v304_v34 = vld [vmem:[#allocation2 + $0x60] sm:$0xff]  ;;  %vm515_vm1 = vcmp.ge.s32.totalorder %v1449_v6, 8  ;;  %vm516_vm2 = vcmp.lt.s32.totalorder %v1449_v6, 12  ;;  %vm518_vm3 = vcmp.ge.s32.totalorder %v1449_v6, 12 }
  0x6b   : > { %904 = vmatprep.subr.bf16.mxu0 %v1218_v0  ;;  %v914_v33 = vpack.c.bf16 %v303_v29, %v302_v28  ;;  %v305_v35 = vld [vmem:[#allocation2 + $0x68] sm:$0xff]  ;;  %v935_v36 = vpack.c.bf16 %v395_v32, %v394_v31  ;;  %v396_v37 = vld [vmem:[#allocation5 + $0x50] sm:$0xff]  ;;  %v397_v38 = vld [vmem:[#allocation5 + $0x58] sm:$0xff]  ;;  %vm519_vm4 = vcmp.lt.s32.totalorder %v1449_v6, 17  ;;  %vm481_vm9 = vcmp.ge.s32.totalorder %v1449_v6, 3  ;;  %s1141_s9 = scalar_lea.vmem %s1492_s13, 128 }
  0x6c   : > { %v917_v39 = vpack.c.bf16 %v305_v35, %v304_v34  ;;  %v306_v40 = vld [vmem:[#allocation2 + $0x70] sm:$0xff]  ;;  %v307_v41 = vld [vmem:[#allocation2 + $0x78] sm:$0xff]  ;;  %v938_v42 = vpack.c.bf16 %v397_v38, %v396_v37  ;;  %v398_v43 = vld [vmem:[#allocation5 + $0x60] sm:$0xff]  ;;  %vm482_vm10 = vcmp.lt.s32.totalorder %v1449_v6, 5  ;;  %vm484_vm11 = vcmp.ge.s32.totalorder %v1449_v6, 17  ;;  %p1142_p4 = scmp.ne.s32.totalorder %s1492_s13, %s1141_s9  ;;  %p1559_p7 = scmp.ne.s32.totalorder %s1547_s7, 0 }
  0x6d   : > { %927 = vmatpush3.bf16.msra.mxu1 %v926_v18  ;;  %v399_v44 = vld [vmem:[#allocation5 + $0x68] sm:$0xff]  ;;  %v920_v45 = vpack.c.bf16 %v307_v41, %v306_v40  ;;  %v291_v47 = vld [vmem:[%s290_s15] sm:$0xff]  ;;  %v400_v48 = vld [vmem:[#allocation5 + $0x70] sm:$0xff]  ;;  %vm485_vm12 = vcmp.lt.s32.totalorder %v1449_v6, 19  ;;  %s1221_s12 = smov [#allocation8]  }
  0x6e   : > { %906 = vmatpush3.bf16.msra.mxu0 %v905_v14  ;;  %928 = vmatprep.subr.bf16.mxu1 %v1218_v0  ;;  %v941_v46 = vpack.c.bf16 %v399_v44, %v398_v43  ;;  %v401_v49 = vld [vmem:[#allocation5 + $0x78] sm:$0xff]  ;;  %v736_v51 = vld [vmem:[%s1536_s2] ss:$0 sm:$0xff]  ;;  %v530_v57 = vld [vmem:[#allocation7 + $0x8] sm:$0xff]  ;;  %p1143_p8 = pnand %p1142_p4, %p1559_p7  ;;  %s1145_s16 = sshll.u32 %s1221_s12, 4  ;;  %s1146_s16 = int_to_ptr.vmem [resolvable:$false] %s1145_s16 }
  0x6f   : > { %907 = vmatprep.subr.bf16.mxu0 %v1218_v0  ;;  %v944_v50 = vpack.c.bf16 %v401_v49, %v400_v48  ;;  %v529_v56 = vld [vmem:[#allocation7] sm:$0xff]  ;;  %v531_v58 = vld [vmem:[#allocation7 + $0x10] sm:$0xff]  ;;  %v532_v60 = vld [vmem:[#allocation7 + $0x18] sm:$0xff]  ;;  %s1147_s28 = scalar_lea.vmem %s1146_s16, 256  ;;  %p1148_p13 = scmp.lt.s32.totalorder %s1492_s13, %s1146_s16 }
  0x70   : > { %v947_v59 = vpack.c.bf16 %v530_v57, %v529_v56  ;;  %v950_v61 = vpack.c.bf16 %v532_v60, %v531_v58  ;;  %v533_v62 = vld [vmem:[#allocation7 + $0x20] sm:$0xff]  ;;  %v534_v63 = vld [vmem:[#allocation7 + $0x28] sm:$0xff]  ;;  %v535_v2 = vld [vmem:[#allocation7 + $0x30] sm:$0xff]  ;;  %p1144_p11 = pneg %p1143_p8  ;;  %p1149_p1 = scmp.lt.s32.totalorder %s1147_s28, %s1141_s9 }
  0x71   : > { %930 = vmatpush3.bf16.msra.mxu1 %v929_v24  ;;  %v536_v3 = vld [vmem:[#allocation7 + $0x38] sm:$0xff]  ;;  %vm517_vm5 = vmand %vm515_vm1, %vm516_vm2  ;;  %v737_v7 = vld [vmem:[%s1538_s4] ss:$0 sm:$0xff]  ;;  %vm506_vm1 = vcmp.lt.s32.totalorder %v1449_v6, 8 }
  0x72   : > { %909 = vmatpush3.bf16.msra.mxu0 %v908_v21  ;;  %931 = vmatprep.subr.bf16.mxu1 %v1218_v0  ;;  %v956_v4 = vpack.c.bf16 %v536_v3, %v535_v2  ;;  %vm520_vm6 = vmand %vm518_vm3, %vm519_vm4  ;;  %v537_v13 = vld [vmem:[#allocation7 + $0x40] sm:$0xff]  ;;  %v538_v14 = vld [vmem:[#allocation7 + $0x48] sm:$0xff]  ;;  %p1150_p6 = por %p1149_p1, %p1148_p13 }
  0x73   : > { %910 = vmatprep.subr.bf16.mxu0 %v1218_v0  ;;  %vm1458_vm7 = vmor %vm517_vm5, %vm520_vm6  ;;  %v959_v15 = vpack.c.bf16 %v538_v14, %v537_v13  ;;  %v539_v16 = vld [vmem:[#allocation7 + $0x50] sm:$0xff]  ;;  %v540_v17 = vld [vmem:[#allocation7 + $0x58] sm:$0xff] }
  0x74   : > { %v962_v18 = vpack.c.bf16 %v540_v17, %v539_v16  ;;  %v541_v19 = vld [vmem:[#allocation7 + $0x60] sm:$0xff]  ;;  %v542_v20 = vld [vmem:[#allocation7 + $0x68] sm:$0xff]  ;;  %v543_v22 = vld [vmem:[#allocation7 + $0x70] sm:$0xff]  ;;  %p1151_p9 = pnand %p1150_p6, %p1144_p11 }
  0x75   : > { %933 = vmatpush3.bf16.msra.mxu1 %v932_v30  ;;  %v965_v21 = vpack.c.bf16 %v542_v20, %v541_v19  ;;  %v544_v23 = vld [vmem:[#allocation7 + $0x78] sm:$0xff]  ;;  %vm483_vm13 = vmand %vm481_vm9, %vm482_vm10 }
  0x76   : > { %912 = vmatpush3.bf16.msra.mxu0 %v911_v27  ;;  %934 = vmatprep.subr.bf16.mxu1 %v1218_v0  ;;  %v968_v24 = vpack.c.bf16 %v544_v23, %v543_v22  ;;  %vm486_vm14 = vmand %vm484_vm11, %vm485_vm12 }
  0x77   : > { %913 = vmatprep.subr.bf16.mxu0 %v1218_v0  ;;  %vm487_vm15 = vmor %vm483_vm13, %vm486_vm14 }
  0x79   : > { %936 = vmatpush3.bf16.msra.mxu1 %v935_v36 }
  0x7a   : > { %915 = vmatpush3.bf16.msra.mxu0 %v914_v33  ;;  %937 = vmatprep.subr.bf16.mxu1 %v1218_v0 }
  0x7b   : > { %916 = vmatprep.subr.bf16.mxu0 %v1218_v0 }
  0x7d   : > { %939 = vmatpush3.bf16.msra.mxu1 %v938_v42 }
  0x7e   : > { %918 = vmatpush3.bf16.msra.mxu0 %v917_v39  ;;  %940 = vmatprep.subr.bf16.mxu1 %v1218_v0 }
  0x7f   : > { %919 = vmatprep.subr.bf16.mxu0 %v1218_v0 }
  0x81   : > { %942 = vmatpush3.bf16.msra.mxu1 %v941_v46 }
  0x82   : > { %921 = vmatpush3.bf16.msra.mxu0 %v920_v45  ;;  %943 = vmatprep.subr.bf16.mxu1 %v1218_v0 }
  0x83   : > { %946 = vmatprep.subr.bf16.mxu0 %v1218_v0 }
  0x85   : > { %826 = vmatmul.mubr.f32.vlgmr.msra.gmra.mrb[0].mxu0 %v291_v47  ;;  %945 = vmatpush3.bf16.msra.mxu1 %v944_v50 }
  0x86   : > { %895 = vmatprep.mubr.msk.f32.mxu0 %vm1219_vm0, %v1220_v1  ;;  %948 = vmatpush3.bf16.msra.mxu0 %v947_v59  ;;  %v953_v1 = vpack.c.bf16 %v534_v63, %v533_v62  ;;  %vm505_vm0 = vcmp.ge.s32.totalorder %v1449_v6, 5 }
  0x87   : > { %949 = vmatprep.subr.bf16.mxu0 %v1218_v0  ;;  %vm507_vm2 = vmand %vm505_vm0, %vm506_vm1 }
  0x8a   : > { %951 = vmatpush3.bf16.msra.mxu0 %v950_v61 }
  0x8b   : > { %952 = vmatprep.subr.bf16.mxu0 %v1218_v0 }
  0x8e   : > { %954 = vmatpush3.bf16.msra.mxu0 %v953_v1 }
  0x8f   : > { %955 = vmatprep.subr.bf16.mxu0 %v1218_v0 }
  0x92   : > { %957 = vmatpush3.bf16.msra.mxu0 %v956_v4 }
  0x93   : > { %958 = vmatprep.subr.bf16.mxu0 %v1218_v0 }
  0x96   : > { %960 = vmatpush3.bf16.msra.mxu0 %v959_v15 }
  0x97   : > { %961 = vmatprep.subr.bf16.mxu0 %v1218_v0 }
  0x9a   : > { %963 = vmatpush3.bf16.msra.mxu0 %v962_v18 }
  0x9b   : > { %964 = vmatprep.subr.bf16.mxu0 %v1218_v0 }
  0x9e   : > { %966 = vmatpush3.bf16.msra.mxu0 %v965_v21 }
  0x9f   : > { %967 = vmatprep.subr.bf16.mxu0 %v1218_v0 }
  0xa2   : > { %969 = vmatpush3.bf16.msra.mxu0 %v968_v24 }
 0x158   : > { %v381_v52 = vpop.f32.mrb[0].mxu0 }
 0x159   : > { %v382_v53 = vadd.f32 %v736_v51, %v381_v52  ;;  %v827_v54 = vpop.f32.mrb[1].mxu0 }
 0x15b   : > { %v385_v55 = vmax.f32 %v382_v53, 0.0 }
 0x15d   : > { %861 = vmatmul.mubr.f32.vlgmr.msra.gmra.mrb[0].mxu1 %v385_v55 }
 0x230   : > { %v475_v8 = vpop.f32.mrb[0].mxu1 }
 0x231   : > { %v1462_v10 = vadd.f32 %v737_v7, %v475_v8  ;;  %v862_v11 = vpop.f32.mrb[1].mxu1 }
 0x233   : > { %v522_v12 = vsel %vm1458_vm7, %v1462_v10, -inf  ;;  %v489_v30 = vand.u32 2147483647, %v1462_v10  ;;  %v508_v34 = vsub.f32 0.0, %v1462_v10  ;;  %v488_v46 = vmax.f32 %v1462_v10, 0.0 }
 0x234   : > { %523 = vmax.xlane.f32.xlu0 %v522_v12 }
 0x235   : > { %v490_v31 = vsub.f32 0.0, %v489_v30  ;;  %v509_v35 = vmul.f32 1.442695, %v508_v34 }
 0x237   : > { %v491_v32 = vmul.f32 1.442695, %v490_v31 }
 0x2c1   : > { %v524_v25 = vpop.xlane.xlu0 %523 }
 0x2c2   : > { %v525_v26 = vsub.f32 %v1462_v10, %v524_v25 }
 0x2c4   : > { %v526_v27 = vsel %vm1458_vm7, %v525_v26, -inf }
 0x2c5   : > { %v527_v28 = vmul.f32 1.442695, %v526_v27 }
 0x2c7   : > { %1045 = vpow2.f32 %v527_v28 }
 0x2c8   : > { %1047 = vpow2.f32 %v491_v32 }
 0x2d1   : > { %v1046_v29 = vpop.eup %1045 }
 0x2d2   : > { %896 = vmatmul.mubr.f32.vlgmr.msra.gmra.mrb[2].mxu0 %v1046_v29  ;;  %v1048_v33 = vpop.eup %1047 }
 0x2d3   : > { %v493_v0 = vadd.f32 1.0, %v1048_v33  ;;  %v496_v36 = vmul.f32 -0.5, %v1048_v33  ;;  %v499_v39 = vand.u32 2147483647, %v1048_v33 }
 0x2d5   : > { %1049 = vlog2.f32 %v493_v0  ;;  %v497_v38 = vadd.f32 1.0, %v496_v36  ;;  %vm500_vm8 = vcmp.lt.f32.partialorder %v499_v39, 0.0004427343 }
 0x2d6   : > { %1051 = vpow2.f32 %v509_v35 }
 0x2d7   : > { %v498_v42 = vmul.f32 %v1048_v33, %v497_v38 }
 0x2df   : > { %v1050_v37 = vpop.eup %1049 }
 0x2e0   : > { %v1052_v40 = vpop.eup %1051  ;;  %v495_v41 = vmul.f32 0.6931472, %v1050_v37 }
 0x2e1   : > { %v511_v43 = vadd.f32 1.0, %v1052_v40 }
 0x2e2   : > { %v501_v45 = vsel %vm500_vm8, %v498_v42, %v495_v41 }
 0x2e3   : > { %v502_v49 = vadd.f32 %v501_v45, %v488_v46 }
 0x2e5   : > { %v503_v50 = vmin.f32 %v502_v49, 10000.0 }
 0x2e7   : > { %v504_v51 = vsel %vm487_vm15, %v503_v50, %v1462_v10 }
 0x3a5   : > { %v611_v44 = vpop.f32.mrb[2].mxu0 }
 0x3a6   : > { %v615_v47 = vsel %vm1458_vm7, %v611_v44, 1.0  ;;  %v897_v48 = vpop.f32.mrb[3].mxu0 }
 0x3a7   : > { %1053 = vrcp.f32 %v615_v47 }
 0x3a8   : > { %1055 = vrcp.f32 %v511_v43 }
 0x3b1   : > { %v1054_v52 = vpop.eup %1053 }
 0x3b2   : > { %v1056_v53 = vpop.eup %1055  ;;  %v617_v54 = vmul.f32 %v1054_v52, %v1046_v29 }
 0x3b3   : > { %v514_v55 = vsel %vm507_vm2, %v1056_v53, %v504_v51 }
 0x3b4   : > { %v618_v56 = vsel %vm1458_vm7, %v617_v54, %v514_v55 }
 0x3b5   : > { %619 = vst [vmem:[%s286_s10] sm:$0xff] %v618_v56 }
 0x3b6   : > { %1154 = shalt.err (!%p1151_p9)
}
 0x3b7   : > { %s1155_s15 = scalar_lea.hbm %s1490_s23, 128  ;;  %s1159_s18 = scalar_lea.hbm %s1540_s6, 256 }
 0x3b8   : > { %p1156_p2 = scmp.ne.s32.totalorder %s1490_s23, %s1155_s15  ;;  %p1160_p5 = scmp.lt.u32.totalorder %s1490_s23, %s1540_s6 }
 0x3b9   : > { %p1161_p10 = scmp.lt.u32.totalorder %s1159_s18, %s1155_s15  ;;  %p1163_p4 = scmp.lt.u32.totalorder %s1155_s15, %s1490_s23 }
 0x3ba   : > { %p1157_p0 = pnand %p1156_p2, %p1559_p7 }
 0x3bb   : > { %p1162_p12 = por %p1161_p10, %p1160_p5 }
 0x3bc   : > { %p1158_p3 = pneg %p1157_p0 }
 0x3bd   : > { %p1164_p8 = por %p1163_p4, %p1162_p12 }
 0x3bf   : > { %p1165_p11 = pnand %p1164_p8, %p1158_p3 }
 0x3c1   : > { %1168 = shalt.err (!%p1165_p11)
}
 0x3c2   : > { %982 = dma.vmem_to_hbm [thread:$0]  (%p1559_p7), %s1492_s13, 128, %s1490_s23, %s621_s25  }
 0x3c3 PF: > { %p1004_p13 = scmp.ge.s32.totalorder %s1211_s24, 2  ;;  %s646_s26 = sand.u32 1, %s1199_s21  }
 0x3c4   : > { %p1560_p1 = scmp.ne.s32.totalorder %s1548_s8, 0  ;;  %s647_s29 = scalar_lea.sflag [#allocation4], %s646_s26 }
 0x3c6   : > { %p995_p6 = pnand %p1004_p13, %p1560_p1 }
 0x3c8   : > { %1194 = dma.done.wait (!%p995_p6), %s647_s29, 128  }
 0x3c9   : > { %1196 = vsyncadd (!%p995_p6), %s647_s29, 4294967168  ;;  %s1561_s10 = sld [smem:[#allocation12_spill]]  ;;  %s1562_s23 = sld [smem:[#allocation13_spill]] }
 0x3ca   : > { %p18_p9 = scmp.ge.s32.totalorder %s1282_s27, 4   ;;  %s1563_s21 = smov %s1203_s22 }
 0x3cb   : > { %s1565_s24 = smov %s1282_s27 }
 0x3cc   :  { %20 = sbr.rel (!%p18_p9) target bundleno = 5 (0x5), region = 92 }
 0x3cf   : > { %s1564_s22 = smov %s1561_s10 }
 0x3d3   :  { %652 = vsyncpa [#allocation3], 1 }
 0x3d4   :  { %654 = vsyncpa [#allocation3 + $0x1], 1 }
 0x3d5   :  { %655 = vsyncpa [#allocation6], 1 }
 0x3d6   :  { %656 = vsyncpa [#allocation4], 1 }
 0x3d7   :  { %658 = vsyncpa [#allocation4 + $0x1], 1 }

</bundles_post_ra>
